<compile_context>
chip_gen: v7x
topology: tpu7x:2x2x1
jax: 0.10.0
libtpu: 0.0.40
codegen_flags: <defaults>
</compile_context>

<pallas_src>
import math

import jax
import jax.numpy as jnp
from jax.experimental import pallas as pl
from jax.experimental.pallas import tpu as pltpu

_LANE = 128
_SUBLANE = 8


def _vmem_budget_bytes():
    """Conservative scoped-VMEM budget, sized per TPU generation."""
    try:
        # v5e/v6e: 128 MiB physical, v7x: 64 MiB physical (per TensorCore).
        phys = pltpu.get_tpu_info().vmem_capacity_bytes
    except Exception:
        phys = 64 << 20  # assume the smallest generation (v7x) if unavailable
    # 32 MiB scoped is legal on every generation (and raises v5e's 16 MiB
    # default); never ask for more than half of physical to leave headroom
    # for pipeline internals.
    return min(32 << 20, phys // 2)


def _embed_vmem_gather_kernel(ids_smem, table_ref, out_ref):
    # FAST PATH — whole table resident in VMEM.
    #   ids_smem:  (N_pad,)          int32  scalar-prefetched token ids (SMEM)
    #   table_ref: (V, 1, D_pad)     table block, constant index map -> DMA'd once
    #   out_ref:   (tile_n, D_pad)   VMEM output tile for this grid step
    tile_n = out_ref.shape[0]
    base = pl.program_id(0) * tile_n
    # Static Python unroll: output row offset `t` is static; only the table
    # row index is dynamic, and it indexes the leading (untiled) axis of the
    # 3-D table block — the standard dynamic-leading-index pattern.
    for t in range(tile_n):
        row = ids_smem[base + t]
        out_ref[pl.ds(t, 1), :] = table_ref[row]           # (1, D_pad) copy


def _embed_hbm_gather_kernel(ids_smem, table_hbm, out_ref, copy_sems):
    # LARGE-TABLE PATH — table stays in HBM, one row DMA per token.
    #   ids_smem:  (N_pad,)          int32   token ids (SMEM)
    #   table_hbm: (V, D_pad)        embedding table left in HBM (pl.ANY)
    #   out_ref:   (tile_n, D_pad)   VMEM output tile
    #   copy_sems: (tile_n,)         one DMA semaphore per in-flight row copy
    tile_n = out_ref.shape[0]
    base = pl.program_id(0) * tile_n

    # Issue every row DMA for this tile before waiting on any of them so the
    # HBM read latency of all rows overlaps.
    copies = []
    for t in range(tile_n):
        row = ids_smem[base + t]
        cp = pltpu.make_async_copy(
            table_hbm.at[pl.ds(row, 1), :],
            out_ref.at[pl.ds(t, 1), :],
            copy_sems.at[t],
        )
        cp.start()
        copies.append(cp)

    # Reuse the descriptors (perf review): no SMEM re-reads or address math
    # interleaved with the waits.  All rows complete before the step's output
    # writeback, so writing directly into the pipelined out_ref is safe.
    for cp in copies:
        cp.wait()


def embedder_forward(ids, table, *, tile_n=None):
    """ids: int array (any shape); table: (V, D) -> ids.shape + (D,).

    Forward-equivalent to torch.nn.Embedding(V, D, padding_idx=0)(ids) when
    row 0 of `table` is zero (see init_embedding_table).
    """
    lead_shape = ids.shape
    N = int(math.prod(lead_shape)) if lead_shape else 1
    V, D = table.shape
    itemsize = jnp.dtype(table.dtype).itemsize

    # Lane-dense embedding dim.  NOTE: for production vocabularies, pad the
    # table to D % 128 == 0 once at init — this per-call pad would otherwise
    # materialize a full V x D_pad copy every forward.  (Demo uses D == 128,
    # so this branch is skipped.)
    D_pad = ((D + _LANE - 1) // _LANE) * _LANE
    if D_pad != D:
        table = jnp.pad(table, ((0, 0), (0, D_pad - D)))

    budget = _vmem_budget_bytes()
    out_budget = budget // 3          # double-buffered output tile
    table_budget = budget // 3        # VMEM-resident table (fast path only)

    # Fast path when the table fits comfortably in VMEM.  The (V, 1, D_pad)
    # staging can pad each row to 8 sublanes, and the pipeline may double
    # buffer it, so budget conservatively with both factors.
    use_vmem_table = (2 * V * _SUBLANE * D_pad * itemsize) <= table_budget

    if tile_n is None:
        max_tile = out_budget // (2 * D_pad * itemsize)     # 2x = double buffer
        tile_n = min(256 if use_vmem_table else 128, max_tile)
    # Never tile wider than the (8-rounded) token count; keep a multiple of 8.
    n_round8 = ((N + _SUBLANE - 1) // _SUBLANE) * _SUBLANE
    tile_n = min(int(tile_n), n_round8)
    tile_n = max(_SUBLANE, (tile_n // _SUBLANE) * _SUBLANE)

    n_tiles = pl.cdiv(N, tile_n)
    N_pad = n_tiles * tile_n

    # torch.nn.Embedding raises on out-of-range ids; here they are clamped to
    # keep gather addresses in bounds.
    # TODO(synk): optional pl.debug_check on id range under enable_debug_checks.
    ids_flat = jnp.clip(ids.reshape(-1).astype(jnp.int32), 0, V - 1)
    if N_pad != N:
        # Padded slots gather row 0 (the zero padding row); sliced off below.
        ids_flat = jnp.pad(ids_flat, (0, N_pad - N))

    compiler_params = pltpu.CompilerParams(
        dimension_semantics=("parallel",),   # token tiles independent (v7x: 2 TCs)
        vmem_limit_bytes=int(budget),
    )
    out_spec = pl.BlockSpec((tile_n, D_pad), lambda i, ids: (i, 0))
    out_shape = jax.ShapeDtypeStruct((N_pad, D_pad), table.dtype)

    if use_vmem_table:
        table3 = table.reshape(V, 1, D_pad)   # metadata-only reshape in HBM
        out_flat = pl.pallas_call(
            _embed_vmem_gather_kernel,
            out_shape=out_shape,
            grid_spec=pltpu.PrefetchScalarGridSpec(
                num_scalar_prefetch=1,                       # ids -> SMEM
                grid=(n_tiles,),
                in_specs=[
                    # Constant block index => table DMA'd into VMEM once and
                    # kept resident across all grid steps.
                    pl.BlockSpec((V, 1, D_pad), lambda i, ids: (0, 0, 0)),
                ],
                out_specs=out_spec,
            ),
            compiler_params=compiler_params,
        )(ids_flat, table3)
    else:
        out_flat = pl.pallas_call(
            _embed_hbm_gather_kernel,
            out_shape=out_shape,
            grid_spec=pltpu.PrefetchScalarGridSpec(
                num_scalar_prefetch=1,                       # ids -> SMEM
                grid=(n_tiles,),
                in_specs=[
                    pl.BlockSpec(memory_space=pl.ANY),       # table stays in HBM
                ],
                out_specs=out_spec,
                scratch_shapes=[pltpu.SemaphoreType.DMA((tile_n,))],
            ),
            compiler_params=compiler_params,
        )(ids_flat, table)

    out = out_flat[:N, :D]
    return out.reshape(*lead_shape, D)


def init_embedding_table(key, vocab_size, embedding_dim, dtype=jnp.float32):
    """Init matching nn.Embedding(vocab, dim, padding_idx=0): N(0,1) weights
    with row `padding_idx` zeroed.  (Use bf16 dtype for a ~2x HBM-byte saving
    when the downstream model is bf16 — the kernel is pure memory movement.)"""
    w = jax.random.normal(key, (vocab_size, embedding_dim), dtype=dtype)
    w = w.at[0].set(0.0)  # padding_idx=0 row is zeros
    # TODO(synk): a training-time backward kernel must also zero the gradient
    # of row 0 to fully match nn.Embedding(padding_idx=0); forward is exact.
    return w


if __name__ == "__main__":
    key = jax.random.PRNGKey(0)
    k_tab, k_ids = jax.random.split(key)

    vocab_size = 32
    embedding_dim = 128
    batch, seq = 2, 8

    table = init_embedding_table(k_tab, vocab_size, embedding_dim)
    ids = jax.random.randint(k_ids, (batch, seq), 0, vocab_size, dtype=jnp.int32)
    # make sure the padding id appears at least once
    ids = ids.at[0, 0].set(0)

    out = embedder_forward(ids, table)
    out = jax.block_until_ready(out)

    # correctness check vs plain-JAX gather (same semantics as torch embedding)
    ref = table[ids]
    assert out.shape == (batch, seq, embedding_dim)
    assert jnp.allclose(out, ref, atol=0.0), "mismatch vs reference gather"
    assert jnp.allclose(out[0, 0], 0.0), "padding_idx row must be zero"

    print("KERNEL_OK")
</pallas_src>

<mosaic_0001>
module attributes {stable_mosaic.version = 11 : i64} {
  func.func @_embed_vmem_gather_kernel(%arg0: i32, %arg1: memref<16xi32, #tpu.memory_space<smem>>, %arg2: memref<32x1x128xf32, #tpu.memory_space<vmem>>, %arg3: memref<16x128xf32, #tpu.memory_space<vmem>>) attributes {dimension_semantics = [#tpu.dimension_semantics<parallel>], iteration_bounds = array<i64: 1>, scalar_prefetch = 1 : i64, scratch_operands = 0 : i64, tpu.core_type = #tpu.core_type<tc>, window_params = [{pipeline_mode = #tpu.pipeline_mode<synchronous>, transform_indices = @transform_0, window_bounds = array<i64: 32, 1, 128>}, {transform_indices = @transform_1, window_bounds = array<i64: 16, 128>}]} {
    %c16_i32 = arith.constant 16 : i32
    %0 = arith.muli %arg0, %c16_i32 : i32
    %c0_i32 = arith.constant 0 : i32
    %1 = arith.addi %0, %c0_i32 : i32
    %2 = arith.index_cast %1 : i32 to index
    %3 = memref.load %arg1[%2] : memref<16xi32, #tpu.memory_space<smem>>
    %4 = arith.index_cast %3 : i32 to index
    %c0 = arith.constant 0 : index
    %c0_0 = arith.constant 0 : index
    %5 = vector.load %arg2[%4, %c0, %c0_0] : memref<32x1x128xf32, #tpu.memory_space<vmem>>, vector<1x1x128xf32>
    %6 = vector.shape_cast %5 : vector<1x1x128xf32> to vector<1x128xf32>
    %c0_1 = arith.constant 0 : index
    %c0_2 = arith.constant 0 : index
    %7 = vector.load %arg3[%c0_1, %c0_2] : memref<16x128xf32, #tpu.memory_space<vmem>>, vector<1x128xf32>
    tpu.vector_store %arg3[%c0_1, %c0_2], %6 {strides = array<i32>} : memref<16x128xf32, #tpu.memory_space<vmem>>, vector<1x128xf32>,
    %c1_i32 = arith.constant 1 : i32
    %8 = arith.addi %0, %c1_i32 : i32
    %9 = arith.index_cast %8 : i32 to index
    %10 = memref.load %arg1[%9] : memref<16xi32, #tpu.memory_space<smem>>
    %11 = arith.index_cast %10 : i32 to index
    %c0_3 = arith.constant 0 : index
    %c0_4 = arith.constant 0 : index
    %12 = vector.load %arg2[%11, %c0_3, %c0_4] : memref<32x1x128xf32, #tpu.memory_space<vmem>>, vector<1x1x128xf32>
    %13 = vector.shape_cast %12 : vector<1x1x128xf32> to vector<1x128xf32>
    %c1 = arith.constant 1 : index
    %c0_5 = arith.constant 0 : index
    %14 = vector.load %arg3[%c1, %c0_5] : memref<16x128xf32, #tpu.memory_space<vmem>>, vector<1x128xf32>
    tpu.vector_store %arg3[%c1, %c0_5], %13 {strides = array<i32>} : memref<16x128xf32, #tpu.memory_space<vmem>>, vector<1x128xf32>,
    %c2_i32 = arith.constant 2 : i32
    %15 = arith.addi %0, %c2_i32 : i32
    %16 = arith.index_cast %15 : i32 to index
    %17 = memref.load %arg1[%16] : memref<16xi32, #tpu.memory_space<smem>>
    %18 = arith.index_cast %17 : i32 to index
    %c0_6 = arith.constant 0 : index
    %c0_7 = arith.constant 0 : index
    %19 = vector.load %arg2[%18, %c0_6, %c0_7] : memref<32x1x128xf32, #tpu.memory_space<vmem>>, vector<1x1x128xf32>
    %20 = vector.shape_cast %19 : vector<1x1x128xf32> to vector<1x128xf32>
    %c2 = arith.constant 2 : index
    %c0_8 = arith.constant 0 : index
    %21 = vector.load %arg3[%c2, %c0_8] : memref<16x128xf32, #tpu.memory_space<vmem>>, vector<1x128xf32>
    tpu.vector_store %arg3[%c2, %c0_8], %20 {strides = array<i32>} : memref<16x128xf32, #tpu.memory_space<vmem>>, vector<1x128xf32>,
    %c3_i32 = arith.constant 3 : i32
    %22 = arith.addi %0, %c3_i32 : i32
    %23 = arith.index_cast %22 : i32 to index
    %24 = memref.load %arg1[%23] : memref<16xi32, #tpu.memory_space<smem>>
    %25 = arith.index_cast %24 : i32 to index
    %c0_9 = arith.constant 0 : index
    %c0_10 = arith.constant 0 : index
    %26 = vector.load %arg2[%25, %c0_9, %c0_10] : memref<32x1x128xf32, #tpu.memory_space<vmem>>, vector<1x1x128xf32>
    %27 = vector.shape_cast %26 : vector<1x1x128xf32> to vector<1x128xf32>
    %c3 = arith.constant 3 : index
    %c0_11 = arith.constant 0 : index
    %28 = vector.load %arg3[%c3, %c0_11] : memref<16x128xf32, #tpu.memory_space<vmem>>, vector<1x128xf32>
    tpu.vector_store %arg3[%c3, %c0_11], %27 {strides = array<i32>} : memref<16x128xf32, #tpu.memory_space<vmem>>, vector<1x128xf32>,
    %c4_i32 = arith.constant 4 : i32
    %29 = arith.addi %0, %c4_i32 : i32
    %30 = arith.index_cast %29 : i32 to index
    %31 = memref.load %arg1[%30] : memref<16xi32, #tpu.memory_space<smem>>
    %32 = arith.index_cast %31 : i32 to index
    %c0_12 = arith.constant 0 : index
    %c0_13 = arith.constant 0 : index
    %33 = vector.load %arg2[%32, %c0_12, %c0_13] : memref<32x1x128xf32, #tpu.memory_space<vmem>>, vector<1x1x128xf32>
    %34 = vector.shape_cast %33 : vector<1x1x128xf32> to vector<1x128xf32>
    %c4 = arith.constant 4 : index
    %c0_14 = arith.constant 0 : index
    %35 = vector.load %arg3[%c4, %c0_14] : memref<16x128xf32, #tpu.memory_space<vmem>>, vector<1x128xf32>
    tpu.vector_store %arg3[%c4, %c0_14], %34 {strides = array<i32>} : memref<16x128xf32, #tpu.memory_space<vmem>>, vector<1x128xf32>,
    %c5_i32 = arith.constant 5 : i32
    %36 = arith.addi %0, %c5_i32 : i32
    %37 = arith.index_cast %36 : i32 to index
    %38 = memref.load %arg1[%37] : memref<16xi32, #tpu.memory_space<smem>>
    %39 = arith.index_cast %38 : i32 to index
    %c0_15 = arith.constant 0 : index
    %c0_16 = arith.constant 0 : index
    %40 = vector.load %arg2[%39, %c0_15, %c0_16] : memref<32x1x128xf32, #tpu.memory_space<vmem>>, vector<1x1x128xf32>
    %41 = vector.shape_cast %40 : vector<1x1x128xf32> to vector<1x128xf32>
    %c5 = arith.constant 5 : index
    %c0_17 = arith.constant 0 : index
    %42 = vector.load %arg3[%c5, %c0_17] : memref<16x128xf32, #tpu.memory_space<vmem>>, vector<1x128xf32>
    tpu.vector_store %arg3[%c5, %c0_17], %41 {strides = array<i32>} : memref<16x128xf32, #tpu.memory_space<vmem>>, vector<1x128xf32>,
    %c6_i32 = arith.constant 6 : i32
    %43 = arith.addi %0, %c6_i32 : i32
    %44 = arith.index_cast %43 : i32 to index
    %45 = memref.load %arg1[%44] : memref<16xi32, #tpu.memory_space<smem>>
    %46 = arith.index_cast %45 : i32 to index
    %c0_18 = arith.constant 0 : index
    %c0_19 = arith.constant 0 : index
    %47 = vector.load %arg2[%46, %c0_18, %c0_19] : memref<32x1x128xf32, #tpu.memory_space<vmem>>, vector<1x1x128xf32>
    %48 = vector.shape_cast %47 : vector<1x1x128xf32> to vector<1x128xf32>
    %c6 = arith.constant 6 : index
    %c0_20 = arith.constant 0 : index
    %49 = vector.load %arg3[%c6, %c0_20] : memref<16x128xf32, #tpu.memory_space<vmem>>, vector<1x128xf32>
    tpu.vector_store %arg3[%c6, %c0_20], %48 {strides = array<i32>} : memref<16x128xf32, #tpu.memory_space<vmem>>, vector<1x128xf32>,
    %c7_i32 = arith.constant 7 : i32
    %50 = arith.addi %0, %c7_i32 : i32
    %51 = arith.index_cast %50 : i32 to index
    %52 = memref.load %arg1[%51] : memref<16xi32, #tpu.memory_space<smem>>
    %53 = arith.index_cast %52 : i32 to index
    %c0_21 = arith.constant 0 : index
    %c0_22 = arith.constant 0 : index
    %54 = vector.load %arg2[%53, %c0_21, %c0_22] : memref<32x1x128xf32, #tpu.memory_space<vmem>>, vector<1x1x128xf32>
    %55 = vector.shape_cast %54 : vector<1x1x128xf32> to vector<1x128xf32>
    %c7 = arith.constant 7 : index
    %c0_23 = arith.constant 0 : index
    %56 = vector.load %arg3[%c7, %c0_23] : memref<16x128xf32, #tpu.memory_space<vmem>>, vector<1x128xf32>
    tpu.vector_store %arg3[%c7, %c0_23], %55 {strides = array<i32>} : memref<16x128xf32, #tpu.memory_space<vmem>>, vector<1x128xf32>,
    %c8_i32 = arith.constant 8 : i32
    %57 = arith.addi %0, %c8_i32 : i32
    %58 = arith.index_cast %57 : i32 to index
    %59 = memref.load %arg1[%58] : memref<16xi32, #tpu.memory_space<smem>>
    %60 = arith.index_cast %59 : i32 to index
    %c0_24 = arith.constant 0 : index
    %c0_25 = arith.constant 0 : index
    %61 = vector.load %arg2[%60, %c0_24, %c0_25] : memref<32x1x128xf32, #tpu.memory_space<vmem>>, vector<1x1x128xf32>
    %62 = vector.shape_cast %61 : vector<1x1x128xf32> to vector<1x128xf32>
    %c8 = arith.constant 8 : index
    %c0_26 = arith.constant 0 : index
    %63 = vector.load %arg3[%c8, %c0_26] : memref<16x128xf32, #tpu.memory_space<vmem>>, vector<1x128xf32>
    tpu.vector_store %arg3[%c8, %c0_26], %62 {strides = array<i32>} : memref<16x128xf32, #tpu.memory_space<vmem>>, vector<1x128xf32>,
    %c9_i32 = arith.constant 9 : i32
    %64 = arith.addi %0, %c9_i32 : i32
    %65 = arith.index_cast %64 : i32 to index
    %66 = memref.load %arg1[%65] : memref<16xi32, #tpu.memory_space<smem>>
    %67 = arith.index_cast %66 : i32 to index
    %c0_27 = arith.constant 0 : index
    %c0_28 = arith.constant 0 : index
    %68 = vector.load %arg2[%67, %c0_27, %c0_28] : memref<32x1x128xf32, #tpu.memory_space<vmem>>, vector<1x1x128xf32>
    %69 = vector.shape_cast %68 : vector<1x1x128xf32> to vector<1x128xf32>
    %c9 = arith.constant 9 : index
    %c0_29 = arith.constant 0 : index
    %70 = vector.load %arg3[%c9, %c0_29] : memref<16x128xf32, #tpu.memory_space<vmem>>, vector<1x128xf32>
    tpu.vector_store %arg3[%c9, %c0_29], %69 {strides = array<i32>} : memref<16x128xf32, #tpu.memory_space<vmem>>, vector<1x128xf32>,
    %c10_i32 = arith.constant 10 : i32
    %71 = arith.addi %0, %c10_i32 : i32
    %72 = arith.index_cast %71 : i32 to index
    %73 = memref.load %arg1[%72] : memref<16xi32, #tpu.memory_space<smem>>
    %74 = arith.index_cast %73 : i32 to index
    %c0_30 = arith.constant 0 : index
    %c0_31 = arith.constant 0 : index
    %75 = vector.load %arg2[%74, %c0_30, %c0_31] : memref<32x1x128xf32, #tpu.memory_space<vmem>>, vector<1x1x128xf32>
    %76 = vector.shape_cast %75 : vector<1x1x128xf32> to vector<1x128xf32>
    %c10 = arith.constant 10 : index
    %c0_32 = arith.constant 0 : index
    %77 = vector.load %arg3[%c10, %c0_32] : memref<16x128xf32, #tpu.memory_space<vmem>>, vector<1x128xf32>
    tpu.vector_store %arg3[%c10, %c0_32], %76 {strides = array<i32>} : memref<16x128xf32, #tpu.memory_space<vmem>>, vector<1x128xf32>,
    %c11_i32 = arith.constant 11 : i32
    %78 = arith.addi %0, %c11_i32 : i32
    %79 = arith.index_cast %78 : i32 to index
    %80 = memref.load %arg1[%79] : memref<16xi32, #tpu.memory_space<smem>>
    %81 = arith.index_cast %80 : i32 to index
    %c0_33 = arith.constant 0 : index
    %c0_34 = arith.constant 0 : index
    %82 = vector.load %arg2[%81, %c0_33, %c0_34] : memref<32x1x128xf32, #tpu.memory_space<vmem>>, vector<1x1x128xf32>
    %83 = vector.shape_cast %82 : vector<1x1x128xf32> to vector<1x128xf32>
    %c11 = arith.constant 11 : index
    %c0_35 = arith.constant 0 : index
    %84 = vector.load %arg3[%c11, %c0_35] : memref<16x128xf32, #tpu.memory_space<vmem>>, vector<1x128xf32>
    tpu.vector_store %arg3[%c11, %c0_35], %83 {strides = array<i32>} : memref<16x128xf32, #tpu.memory_space<vmem>>, vector<1x128xf32>,
    %c12_i32 = arith.constant 12 : i32
    %85 = arith.addi %0, %c12_i32 : i32
    %86 = arith.index_cast %85 : i32 to index
    %87 = memref.load %arg1[%86] : memref<16xi32, #tpu.memory_space<smem>>
    %88 = arith.index_cast %87 : i32 to index
    %c0_36 = arith.constant 0 : index
    %c0_37 = arith.constant 0 : index
    %89 = vector.load %arg2[%88, %c0_36, %c0_37] : memref<32x1x128xf32, #tpu.memory_space<vmem>>, vector<1x1x128xf32>
    %90 = vector.shape_cast %89 : vector<1x1x128xf32> to vector<1x128xf32>
    %c12 = arith.constant 12 : index
    %c0_38 = arith.constant 0 : index
    %91 = vector.load %arg3[%c12, %c0_38] : memref<16x128xf32, #tpu.memory_space<vmem>>, vector<1x128xf32>
    tpu.vector_store %arg3[%c12, %c0_38], %90 {strides = array<i32>} : memref<16x128xf32, #tpu.memory_space<vmem>>, vector<1x128xf32>,
    %c13_i32 = arith.constant 13 : i32
    %92 = arith.addi %0, %c13_i32 : i32
    %93 = arith.index_cast %92 : i32 to index
    %94 = memref.load %arg1[%93] : memref<16xi32, #tpu.memory_space<smem>>
    %95 = arith.index_cast %94 : i32 to index
    %c0_39 = arith.constant 0 : index
    %c0_40 = arith.constant 0 : index
    %96 = vector.load %arg2[%95, %c0_39, %c0_40] : memref<32x1x128xf32, #tpu.memory_space<vmem>>, vector<1x1x128xf32>
    %97 = vector.shape_cast %96 : vector<1x1x128xf32> to vector<1x128xf32>
    %c13 = arith.constant 13 : index
    %c0_41 = arith.constant 0 : index
    %98 = vector.load %arg3[%c13, %c0_41] : memref<16x128xf32, #tpu.memory_space<vmem>>, vector<1x128xf32>
    tpu.vector_store %arg3[%c13, %c0_41], %97 {strides = array<i32>} : memref<16x128xf32, #tpu.memory_space<vmem>>, vector<1x128xf32>,
    %c14_i32 = arith.constant 14 : i32
    %99 = arith.addi %0, %c14_i32 : i32
    %100 = arith.index_cast %99 : i32 to index
    %101 = memref.load %arg1[%100] : memref<16xi32, #tpu.memory_space<smem>>
    %102 = arith.index_cast %101 : i32 to index
    %c0_42 = arith.constant 0 : index
    %c0_43 = arith.constant 0 : index
    %103 = vector.load %arg2[%102, %c0_42, %c0_43] : memref<32x1x128xf32, #tpu.memory_space<vmem>>, vector<1x1x128xf32>
    %104 = vector.shape_cast %103 : vector<1x1x128xf32> to vector<1x128xf32>
    %c14 = arith.constant 14 : index
    %c0_44 = arith.constant 0 : index
    %105 = vector.load %arg3[%c14, %c0_44] : memref<16x128xf32, #tpu.memory_space<vmem>>, vector<1x128xf32>
    tpu.vector_store %arg3[%c14, %c0_44], %104 {strides = array<i32>} : memref<16x128xf32, #tpu.memory_space<vmem>>, vector<1x128xf32>,
    %c15_i32 = arith.constant 15 : i32
    %106 = arith.addi %0, %c15_i32 : i32
    %107 = arith.index_cast %106 : i32 to index
    %108 = memref.load %arg1[%107] : memref<16xi32, #tpu.memory_space<smem>>
    %109 = arith.index_cast %108 : i32 to index
    %c0_45 = arith.constant 0 : index
    %c0_46 = arith.constant 0 : index
    %110 = vector.load %arg2[%109, %c0_45, %c0_46] : memref<32x1x128xf32, #tpu.memory_space<vmem>>, vector<1x1x128xf32>
    %111 = vector.shape_cast %110 : vector<1x1x128xf32> to vector<1x128xf32>
    %c15 = arith.constant 15 : index
    %c0_47 = arith.constant 0 : index
    %112 = vector.load %arg3[%c15, %c0_47] : memref<16x128xf32, #tpu.memory_space<vmem>>, vector<1x128xf32>
    tpu.vector_store %arg3[%c15, %c0_47], %111 {strides = array<i32>} : memref<16x128xf32, #tpu.memory_space<vmem>>, vector<1x128xf32>,
    return
  }
  func.func @transform_0(%arg0: i32, %arg1: memref<16xi32, #tpu.memory_space<smem>>) -> (i32, i32, i32) {
    %c0_i32 = arith.constant 0 : i32
    %c0_i32_0 = arith.constant 0 : i32
    %c0_i32_1 = arith.constant 0 : i32
    %c0_i32_2 = arith.constant 0 : i32
    return %c0_i32, %c0_i32_0, %c0_i32_1 : i32, i32, i32
  }
  func.func @transform_1(%arg0: i32, %arg1: memref<16xi32, #tpu.memory_space<smem>>) -> (i32, i32) {
    %c0_i32 = arith.constant 0 : i32
    %c0_i32_0 = arith.constant 0 : i32
    return %arg0, %c0_i32 : i32, i32
  }
}

</mosaic_0001>

<bundles_post_ra>
// kernel: tpu_custom_call.1
= control target key start
LH: loop header
LB: loop body
LE: loop exit
PB: predicated region body
PF: predicated region fallthrough
CT: control target
= control target key end

     0   :  { %s300_s0 = inlined_call_operand.hbm [shape: s32[16], index: 0, kind: input, shape index: {}]   ;;  %s301_s1 = inlined_call_operand.hbm [shape: f32[32,1,128], index: 1, kind: input, shape index: {}]   ;;  %s302_s2 = inlined_call_operand.hbm [shape: f32[16,128], index: 2, kind: output, shape index: {}]  }
   0x1   :  { %s163_s11 = scalar_lea.hbm %s300_s0, 16 }
   0x2   :  { %p164_p0 = scmp.ne.s32.totalorder %s300_s0, %s163_s11  ;;  %p167_p1 = scmp.lt.u32.totalorder %s163_s11, %s300_s0 }
   0x4   :  { %p169_p2 = pnand %p167_p1, %p164_p0 }
   0x6   :  { %172 = shalt.err (!%p169_p2)  }
   0x7   :  { %s223_s16 = smov [#allocation3]  }
   0x8   :  { %8 = dma.hbm_to_smem %s300_s0, 16, %s223_s16, [#allocation2] }
   0x9   :  { %217 = dma.done.wait [#allocation2], 16 }
   0xa   :  { %218 = vsyncadd [#allocation2], 4294967280 }
   0xb   :  { %10 = sfence }
   0xc   :  { %11 = vsyncpa [#allocation5], 0 }
   0xd   :  { %12 = vsyncpa [#allocation6], 0  ;;  %s224_s19 = smov [#allocation4]   ;;  %s173_s23 = scalar_lea.hbm %s301_s1, 512 }
   0xe   :  { %s18_s20 = sshll.u32 %s224_s19, 4  ;;  %p174_p3 = scmp.ne.s32.totalorder %s301_s1, %s173_s23  ;;  %s19_s20 = int_to_ptr.vmem [resolvable:$true] %s18_s20 }
   0xf   :  { %p177_p4 = scmp.lt.u32.totalorder %s173_s23, %s301_s1 }
  0x11   :  { %p179_p5 = pnand %p177_p4, %p174_p3 }
  0x13   :  { %182 = shalt.err (!%p179_p5)
}
  0x14   :  { %s183_s0 = scalar_lea.vmem %s19_s20, 512  ;;  %p188_p7 = scmp.lt.s32.totalorder %s19_s20, %s19_s20 }
  0x15   :  { %p184_p6 = scmp.ne.s32.totalorder %s19_s20, %s183_s0  ;;  %p189_p8 = scmp.lt.s32.totalorder %s183_s0, %s183_s0 }
  0x17   :  { %p190_p9 = por %p189_p8, %p188_p7 }
  0x19   :  { %p191_p10 = pnand %p190_p9, %p184_p6 }
  0x1b   :  { %194 = shalt.err (!%p191_p10)
}
  0x1c   :  { %s225_s28 = smov 16   ;;  %s226_s29 = smov 1  }
  0x1d   :  { %24 = dma.hbm_to_vmem [thread:$0]  %s301_s1, 512, %s19_s20, [#allocation5], %s225_s28, %s225_s28, %s226_s29  }
  0x1e   :  { %219 = dma.done.wait [#allocation5], 512  }
  0x1f   :  { %220 = vsyncadd [#allocation5], 4294966784  ;;  %s29_s4 = sld [smem:[#allocation3]]  ;;  %s141_s5 = sld [smem:[#allocation3 + $0x1]] }
  0x20   :  { %s142_s6 = sld [smem:[#allocation3 + $0x2]]  ;;  %s143_s7 = sld [smem:[#allocation3 + $0x3]] }
  0x21   :  { %s144_s8 = sld [smem:[#allocation3 + $0x4]]  ;;  %s145_s9 = sld [smem:[#allocation3 + $0x5]] }
  0x22   :  { %s146_s10 = sld [smem:[#allocation3 + $0x6]]  ;;  %s147_s11 = sld [smem:[#allocation3 + $0x7]] }
  0x23   :  { %s269_s12 = sld [smem:[#allocation3 + $0x8]]  ;;  %s271_s13 = sld [smem:[#allocation3 + $0x9]] }
  0x24   :  { %s273_s14 = sld [smem:[#allocation3 + $0xa]]  ;;  %s275_s15 = sld [smem:[#allocation3 + $0xb]] }
  0x25   :  { %s30_s16 = scalar_lea.vmem [#allocation4], %s29_s4  ;;  %s35_s1 = scalar_lea.vmem [#allocation4], %s141_s5 }
  0x26   :  { %v31_v0 = vld [vmem:[%s30_s16] sm:$0x1]  ;;  %s40_s17 = scalar_lea.vmem [#allocation4], %s142_s6  ;;  %s45_s18 = scalar_lea.vmem [#allocation4], %s143_s7 }
  0x27   :  { %v36_v1 = vld [vmem:[%s35_s1] sm:$0x1]  ;;  %32 = vst [vmem:[#allocation7] sm:$0x1] %v31_v0  ;;  %s50_s19 = scalar_lea.vmem [#allocation4], %s144_s8  ;;  %s55_s20 = scalar_lea.vmem [#allocation4], %s145_s9 }
  0x28   :  { %37 = vst [vmem:[#allocation7 + $0x1] sm:$0x1] %v36_v1  ;;  %v41_v2 = vld [vmem:[%s40_s17] sm:$0x1]  ;;  %s60_s21 = scalar_lea.vmem [#allocation4], %s146_s10  ;;  %s65_s22 = scalar_lea.vmem [#allocation4], %s147_s11 }
  0x29   :  { %v46_v3 = vld [vmem:[%s45_s18] sm:$0x1]  ;;  %42 = vst [vmem:[#allocation7 + $0x2] sm:$0x1] %v41_v2  ;;  %s70_s23 = scalar_lea.vmem [#allocation4], %s269_s12  ;;  %s75_s24 = scalar_lea.vmem [#allocation4], %s271_s13 }
  0x2a   :  { %47 = vst [vmem:[#allocation7 + $0x3] sm:$0x1] %v46_v3  ;;  %v51_v4 = vld [vmem:[%s50_s19] sm:$0x1]  ;;  %s80_s25 = scalar_lea.vmem [#allocation4], %s273_s14  ;;  %s85_s26 = scalar_lea.vmem [#allocation4], %s275_s15 }
  0x2b   :  { %v56_v5 = vld [vmem:[%s55_s20] sm:$0x1]  ;;  %52 = vst [vmem:[#allocation7 + $0x4] sm:$0x1] %v51_v4  ;;  %s152_s27 = sld [smem:[#allocation3 + $0xc]]  ;;  %s153_s0 = sld [smem:[#allocation3 + $0xd]] }
  0x2c   :  { %57 = vst [vmem:[#allocation7 + $0x5] sm:$0x1] %v56_v5  ;;  %v61_v6 = vld [vmem:[%s60_s21] sm:$0x1]  ;;  %s154_s28 = sld [smem:[#allocation3 + $0xe]]  ;;  %s155_s29 = sld [smem:[#allocation3 + $0xf]] }
  0x2d   :  { %v66_v7 = vld [vmem:[%s65_s22] sm:$0x1]  ;;  %62 = vst [vmem:[#allocation7 + $0x6] sm:$0x1] %v61_v6  ;;  %s227_s30 = smov [#allocation7]  }
  0x2e   :  { %67 = vst [vmem:[#allocation7 + $0x7] sm:$0x1] %v66_v7  ;;  %v71_v8 = vld [vmem:[%s70_s23] sm:$0x1]  ;;  %s113_s3 = sshll.u32 %s227_s30, 4  ;;  %s281_s3 = int_to_ptr.vmem [resolvable:$true] %s113_s3 }
  0x2f   :  { %v76_v9 = vld [vmem:[%s75_s24] sm:$0x1]  ;;  %72 = vst [vmem:[#allocation7 + $0x8] sm:$0x1] %v71_v8  ;;  %s195_s8 = scalar_lea.vmem %s281_s3, 256  ;;  %p200_p12 = scmp.lt.s32.totalorder %s281_s3, %s281_s3 }
  0x30   :  { %77 = vst [vmem:[#allocation7 + $0x9] sm:$0x1] %v76_v9  ;;  %v81_v10 = vld [vmem:[%s80_s25] sm:$0x1]  ;;  %p196_p11 = scmp.ne.s32.totalorder %s281_s3, %s195_s8  ;;  %p201_p13 = scmp.lt.s32.totalorder %s195_s8, %s195_s8 }
  0x31   :  { %v86_v11 = vld [vmem:[%s85_s26] sm:$0x1]  ;;  %82 = vst [vmem:[#allocation7 + $0xa] sm:$0x1] %v81_v10  ;;  %s90_s4 = scalar_lea.vmem [#allocation4], %s152_s27  ;;  %s95_s5 = scalar_lea.vmem [#allocation4], %s153_s0 }
  0x32   :  { %87 = vst [vmem:[#allocation7 + $0xb] sm:$0x1] %v86_v11  ;;  %v91_v12 = vld [vmem:[%s90_s4] sm:$0x1]  ;;  %s100_s6 = scalar_lea.vmem [#allocation4], %s154_s28  ;;  %s105_s7 = scalar_lea.vmem [#allocation4], %s155_s29 }
  0x33   :  { %92 = vst [vmem:[#allocation7 + $0xc] sm:$0x1] %v91_v12  ;;  %v96_v13 = vld [vmem:[%s95_s5] sm:$0x1]  ;;  %p202_p0 = por %p201_p13, %p200_p12 }
  0x34   :  { %v101_v14 = vld [vmem:[%s100_s6] sm:$0x1]  ;;  %97 = vst [vmem:[#allocation7 + $0xd] sm:$0x1] %v96_v13 }
  0x35   :  { %102 = vst [vmem:[#allocation7 + $0xe] sm:$0x1] %v101_v14  ;;  %v106_v15 = vld [vmem:[%s105_s7] sm:$0x1]  ;;  %p203_p1 = pnand %p202_p0, %p196_p11 }
  0x36   :  { %107 = vst [vmem:[#allocation7 + $0xf] sm:$0x1] %v106_v15 }
  0x37   :  { %206 = shalt.err (!%p203_p1)
}
  0x38   :  { %s207_s11 = scalar_lea.hbm %s302_s2, 256 }
  0x39   :  { %p208_p2 = scmp.ne.s32.totalorder %s302_s2, %s207_s11  ;;  %p211_p3 = scmp.lt.u32.totalorder %s207_s11, %s302_s2 }
  0x3b   :  { %p213_p4 = pnand %p211_p3, %p208_p2 }
  0x3d   :  { %216 = shalt.err (!%p213_p4)
}
  0x3e   :  { %s228_s16 = smov 128   ;;  %s229_s1 = smov 8  }
  0x3f   :  { %119 = dma.vmem_to_hbm [thread:$0]  %s281_s3, 256, %s302_s2, [#allocation6], %s228_s16, %s228_s16, %s229_s1  }
  0x40   :  { %221 = dma.done.wait [#allocation6], 256  }
  0x41   :  { %222 = vsyncadd [#allocation6], 4294967040 }
  0x42   :  { %123 = vsyncpa [#allocation5], 1 }
  0x43   :  { %124 = vsyncpa [#allocation6], 1 }

</bundles_post_ra>
